<compile_context>
chip_gen: v7x
topology: tpu7x:2x2x1
jax: 0.10.0
libtpu: 0.0.40
codegen_flags: <defaults>
</compile_context>

<pallas_src>
import functools

import jax
import jax.numpy as jnp
from jax import lax
from jax.experimental import pallas as pl
from jax.experimental.pallas import tpu as pltpu


def _attention_kernel(x_ref, wqkv_ref, wout_ref, bias_ref, o_ref, *,
                      tb, n, heads, dim_head):
    # x_ref    : (tb, n, dim)       bf16   (q-scale already folded into wqkv)
    # wqkv_ref : (dim, 3 * inner)   bf16
    # wout_ref : (inner, dim)       bf16
    # bias_ref : (1, dim)           f32
    # o_ref    : (tb, n, dim)       x.dtype
    dim = x_ref.shape[-1]
    inner = heads * dim_head
    rows = tb * n

    # QKV projection for all tb token-rows at once (bf16 in, f32 accumulate).
    x2d = x_ref[...].reshape(rows, dim)                                      # (rows, dim) bf16
    qkv = jnp.dot(x2d, wqkv_ref[...], preferred_element_type=jnp.float32)    # (rows, 3*inner) f32
    w_out = wout_ref[...]                                                    # (inner, dim) bf16

    # Initialize the output-projection accumulator with the to_out bias
    # (hoisted broadcast, done once per grid step).
    proj = jnp.broadcast_to(bias_ref[...], (rows, dim)).astype(jnp.float32)

    for h in range(heads):                      # static unroll over heads
        q0 = 0 * inner + h * dim_head
        k0 = 1 * inner + h * dim_head
        v0 = 2 * inner + h * dim_head
        q = qkv[:, q0:q0 + dim_head].astype(jnp.bfloat16).reshape(tb, n, dim_head)
        k = qkv[:, k0:k0 + dim_head].astype(jnp.bfloat16).reshape(tb, n, dim_head)
        v = qkv[:, v0:v0 + dim_head].astype(jnp.bfloat16).reshape(tb, n, dim_head)

        # Batched QK^T via dot_general contracting last dims (no explicit k.T).
        dots = lax.dot_general(q, k, dimension_numbers=(((2,), (2,)), ((0,), (0,))),
                               preferred_element_type=jnp.float32)           # (tb, n, n) f32
        dots = dots - jnp.max(dots, axis=-1, keepdims=True)
        p = jnp.exp(dots)                                                    # EUP
        inv_l = pl.reciprocal(jnp.sum(p, axis=-1, keepdims=True), approx=True)
        attn = (p * inv_l).astype(jnp.bfloat16)                              # (tb, n, n) bf16

        out_h = lax.dot_general(attn, v, dimension_numbers=(((2,), (1,)), ((0,), (0,))),
                                preferred_element_type=jnp.float32)          # (tb, n, dim_head) f32

        # Per-head accumulation into the output projection (no head concatenate).
        proj = proj + jnp.dot(out_h.reshape(rows, dim_head).astype(jnp.bfloat16),
                              w_out[h * dim_head:(h + 1) * dim_head, :],
                              preferred_element_type=jnp.float32)            # (rows, dim) f32

    o_ref[...] = proj.reshape(tb, n, dim).astype(o_ref.dtype)


def _pick_tb(bp, n, target_rows=512):
    """Largest divisor of bp with tb*n <= target_rows, preferring >= 2 grid steps."""
    divisors = [d for d in range(1, bp + 1) if bp % d == 0]
    tb = 1
    for d in divisors:
        if d * n <= target_rows:
            tb = d
    # Prefer at least 2 grid steps (megacore sharding) when bp allows it.
    if bp // tb < 2:
        for d in reversed(divisors):
            if bp // d >= 2 and d * n <= target_rows:
                tb = d
                break
    return tb


def attention_pallas(x, w_qkv, w_out, b_out, *, heads, dim_head):
    """x: (b, p, n, dim); w_qkv: (dim, 3*heads*dim_head) [in,out layout];
    w_out: (heads*dim_head, dim); b_out: (dim,)."""
    b, p, n, dim = x.shape
    inner = heads * dim_head
    scale = dim_head ** -0.5
    bp = b * p
    tb = _pick_tb(bp, n)

    project_out = not (heads == 1 and dim_head == dim)
    if not project_out:
        # nn.Identity(): inner == dim, so identity weight / zero bias is exact.
        w_out = jnp.eye(inner, dim, dtype=x.dtype)
        b_out = jnp.zeros((dim,), dtype=x.dtype)

    # Fold the q scale into the q columns of the QKV weight (done once on a
    # small weight matrix -> removes rows*inner VPU multiplies per grid step).
    col_scale = jnp.concatenate(
        [jnp.full((inner,), scale, dtype=jnp.float32),
         jnp.ones((2 * inner,), dtype=jnp.float32)])
    w_qkv_scaled = w_qkv.astype(jnp.float32) * col_scale[None, :]

    # bf16 operands for the MXU; accumulation stays in f32 inside the kernel.
    x_flat = x.reshape(bp, n, dim).astype(jnp.bfloat16)
    w_qkv_b = w_qkv_scaled.astype(jnp.bfloat16)
    w_out_b = w_out.astype(jnp.bfloat16)
    b_out_f = b_out.astype(jnp.float32).reshape(1, dim)

    kernel = functools.partial(
        _attention_kernel, tb=tb, n=n, heads=heads, dim_head=dim_head
    )

    out_flat = pl.pallas_call(
        kernel,
        out_shape=jax.ShapeDtypeStruct((bp, n, dim), x.dtype),
        grid_spec=pltpu.PrefetchScalarGridSpec(
            num_scalar_prefetch=0,
            grid=(bp // tb,),
            in_specs=[
                pl.BlockSpec((tb, n, dim), lambda i: (i, 0, 0)),
                pl.BlockSpec((dim, 3 * inner), lambda i: (0, 0)),
                pl.BlockSpec((inner, dim), lambda i: (0, 0)),
                pl.BlockSpec((1, dim), lambda i: (0, 0)),
            ],
            out_specs=pl.BlockSpec((tb, n, dim), lambda i: (i, 0, 0)),
        ),
        compiler_params=pltpu.CompilerParams(
            dimension_semantics=("parallel",),
            # Safe on all generations (v7x physical = 64 MiB); raises v5e's 16 MiB default.
            vmem_limit_bytes=32 * 1024 * 1024,
        ),
    )(x_flat, w_qkv_b, w_out_b, b_out_f)

    return out_flat.reshape(b, p, n, dim)


def attention_reference(x, w_qkv, w_out, b_out, *, heads, dim_head):
    """Pure-JAX f32 reference mirroring the PyTorch forward (incl. to_out bias)."""
    b, p, n, dim = x.shape
    inner = heads * dim_head
    scale = dim_head ** -0.5
    project_out = not (heads == 1 and dim_head == dim)

    qkv = jnp.einsum("bpnc,cf->bpnf", x, w_qkv)
    q, k, v = jnp.split(qkv, 3, axis=-1)

    def to_heads(t):
        return t.reshape(b, p, n, heads, dim_head).transpose(0, 1, 3, 2, 4)

    q, k, v = map(to_heads, (q, k, v))                    # (b, p, h, n, d)
    dots = jnp.einsum("bphnd,bphmd->bphnm", q, k) * scale
    attn = jax.nn.softmax(dots, axis=-1)
    out = jnp.einsum("bphnm,bphmd->bphnd", attn, v)
    out = out.transpose(0, 1, 3, 2, 4).reshape(b, p, n, inner)
    if not project_out:
        return out
    return jnp.einsum("bpni,ic->bpnc", out, w_out) + b_out


if __name__ == "__main__":
    # Small shapes consistent with the module's forward: x is (b, p, n, dim).
    b, p, n, dim = 2, 2, 8, 32
    heads, dim_head = 2, 16
    inner = heads * dim_head

    key = jax.random.PRNGKey(0)
    kx, kqkv, kout, kb = jax.random.split(key, 4)
    x = jax.random.normal(kx, (b, p, n, dim), dtype=jnp.float32)
    # nn.Linear(dim, inner*3, bias=False) and nn.Linear(inner, dim) weights stored in
    # (in_features, out_features) layout so the kernel multiplies x @ W directly
    # (a PyTorch state_dict weight would need a transpose before use).
    w_qkv = jax.random.normal(kqkv, (dim, 3 * inner), dtype=jnp.float32) * (dim ** -0.5)
    w_out = jax.random.normal(kout, (inner, dim), dtype=jnp.float32) * (inner ** -0.5)
    b_out = jax.random.normal(kb, (dim,), dtype=jnp.float32) * 0.1

    out = attention_pallas(x, w_qkv, w_out, b_out, heads=heads, dim_head=dim_head)
    out = jax.block_until_ready(out)

    ref = attention_reference(x, w_qkv, w_out, b_out, heads=heads, dim_head=dim_head)
    # bf16 MXU operands + approx reciprocal vs the all-f32 reference -> loosened tolerance.
    assert out.shape == ref.shape
    assert jnp.allclose(out, ref, atol=5e-2, rtol=5e-2), "Pallas output mismatch vs reference"

    print("KERNEL_OK")
</pallas_src>

<mosaic_0001>
module attributes {stable_mosaic.version = 11 : i64} {
  func.func @_attention_kernel(%arg0: i32, %arg1: memref<2x8x32xbf16, #tpu.memory_space<vmem>>, %arg2: memref<32x96xbf16, #tpu.memory_space<vmem>>, %arg3: memref<32x32xbf16, #tpu.memory_space<vmem>>, %arg4: memref<1x32xf32, #tpu.memory_space<vmem>>, %arg5: memref<2x8x32xf32, #tpu.memory_space<vmem>>) attributes {dimension_semantics = [#tpu.dimension_semantics<parallel>], iteration_bounds = array<i64: 2>, scalar_prefetch = 0 : i64, scratch_operands = 0 : i64, tpu.core_type = #tpu.core_type<tc>, window_params = [{transform_indices = @transform_0, window_bounds = array<i64: 2, 8, 32>}, {pipeline_mode = #tpu.pipeline_mode<synchronous>, transform_indices = @transform_1, window_bounds = array<i64: 32, 96>}, {pipeline_mode = #tpu.pipeline_mode<synchronous>, transform_indices = @transform_2, window_bounds = array<i64: 32, 32>}, {pipeline_mode = #tpu.pipeline_mode<synchronous>, transform_indices = @transform_3, window_bounds = array<i64: 1, 32>}, {transform_indices = @transform_4, window_bounds = array<i64: 2, 8, 32>}]} {
    %c0 = arith.constant 0 : index
    %c0_0 = arith.constant 0 : index
    %c0_1 = arith.constant 0 : index
    %0 = vector.load %arg1[%c0, %c0_0, %c0_1] : memref<2x8x32xbf16, #tpu.memory_space<vmem>>, vector<2x8x32xbf16>
    %1 = vector.shape_cast %0 : vector<2x8x32xbf16> to vector<16x32xbf16>
    %c0_2 = arith.constant 0 : index
    %c0_3 = arith.constant 0 : index
    %2 = vector.load %arg2[%c0_2, %c0_3] : memref<32x96xbf16, #tpu.memory_space<vmem>>, vector<32x96xbf16>
    %cst = arith.constant dense<0.000000e+00> : vector<16x96xf32>
    %3 = tpu.matmul %1, %2, %cst {dimension_numbers = #tpu.dot_dimension_numbers<[1], [0], [0], [1], [0, 0, 1, 1], [], []>} : vector<16x32xbf16>, vector<32x96xbf16>, vector<16x96xf32> -> vector<16x96xf32>
    %c0_4 = arith.constant 0 : index
    %c0_5 = arith.constant 0 : index
    %4 = vector.load %arg3[%c0_4, %c0_5] : memref<32x32xbf16, #tpu.memory_space<vmem>>, vector<32x32xbf16>
    %c0_6 = arith.constant 0 : index
    %c0_7 = arith.constant 0 : index
    %5 = vector.load %arg4[%c0_6, %c0_7] : memref<1x32xf32, #tpu.memory_space<vmem>>, vector<1x32xf32>
    %6 = vector.shape_cast %5 : vector<1x32xf32> to vector<1x32xf32>
    %7 = vector.broadcast %6 : vector<1x32xf32> to vector<16x32xf32>
    %8 = vector.extract_strided_slice %3 {offsets = [0, 0], sizes = [16, 16], strides = [1, 1]} : vector<16x96xf32> to vector<16x16xf32>
    %9 = arith.truncf %8 : vector<16x16xf32> to vector<16x16xbf16>
    %10 = vector.shape_cast %9 : vector<16x16xbf16> to vector<2x8x16xbf16>
    %11 = vector.extract_strided_slice %3 {offsets = [0, 32], sizes = [16, 16], strides = [1, 1]} : vector<16x96xf32> to vector<16x16xf32>
    %12 = arith.truncf %11 : vector<16x16xf32> to vector<16x16xbf16>
    %13 = vector.shape_cast %12 : vector<16x16xbf16> to vector<2x8x16xbf16>
    %14 = vector.extract_strided_slice %3 {offsets = [0, 64], sizes = [16, 16], strides = [1, 1]} : vector<16x96xf32> to vector<16x16xf32>
    %15 = arith.truncf %14 : vector<16x16xf32> to vector<16x16xbf16>
    %16 = vector.shape_cast %15 : vector<16x16xbf16> to vector<2x8x16xbf16>
    %cst_8 = arith.constant dense<0.000000e+00> : vector<2x8x8xf32>
    %17 = tpu.matmul %10, %13, %cst_8 {dimension_numbers = #tpu.dot_dimension_numbers<[2], [2], [1], [1], [0, 0, 0, 1, 1, 1], [0], [0]>} : vector<2x8x16xbf16>, vector<2x8x16xbf16>, vector<2x8x8xf32> -> vector<2x8x8xf32>
    %cst_9 = arith.constant dense<0xFF800000> : vector<2x8xf32>
    %18 = vector.multi_reduction <maximumf>, %17, %cst_9 [2] : vector<2x8x8xf32> to vector<2x8xf32>
    %19 = vector.shape_cast %18 : vector<2x8xf32> to vector<2x8x1xf32>
    %20 = vector.broadcast %19 : vector<2x8x1xf32> to vector<2x8x8xf32>
    %21 = arith.subf %17, %20 : vector<2x8x8xf32>
    %22 = math.exp %21 : vector<2x8x8xf32>
    %cst_10 = arith.constant dense<0.000000e+00> : vector<2x8xf32>
    %23 = vector.multi_reduction <add>, %22, %cst_10 [2] : vector<2x8x8xf32> to vector<2x8xf32>
    %24 = vector.shape_cast %23 : vector<2x8xf32> to vector<2x8x1xf32>
    %25 = tpu.reciprocal %24 {approx = true} : vector<2x8x1xf32> -> vector<2x8x1xf32>
    %26 = vector.broadcast %25 : vector<2x8x1xf32> to vector<2x8x8xf32>
    %27 = arith.mulf %22, %26 : vector<2x8x8xf32>
    %28 = arith.truncf %27 : vector<2x8x8xf32> to vector<2x8x8xbf16>
    %cst_11 = arith.constant dense<0.000000e+00> : vector<2x8x16xf32>
    %29 = tpu.matmul %28, %16, %cst_11 {dimension_numbers = #tpu.dot_dimension_numbers<[2], [1], [1], [2], [0, 0, 0, 1, 1, 2], [0], [0]>} : vector<2x8x8xbf16>, vector<2x8x16xbf16>, vector<2x8x16xf32> -> vector<2x8x16xf32>
    %30 = vector.shape_cast %29 : vector<2x8x16xf32> to vector<16x16xf32>
    %31 = arith.truncf %30 : vector<16x16xf32> to vector<16x16xbf16>
    %32 = vector.extract_strided_slice %4 {offsets = [0, 0], sizes = [16, 32], strides = [1, 1]} : vector<32x32xbf16> to vector<16x32xbf16>
    %cst_12 = arith.constant dense<0.000000e+00> : vector<16x32xf32>
    %33 = tpu.matmul %31, %32, %cst_12 {dimension_numbers = #tpu.dot_dimension_numbers<[1], [0], [0], [1], [0, 0, 1, 1], [], []>} : vector<16x16xbf16>, vector<16x32xbf16>, vector<16x32xf32> -> vector<16x32xf32>
    %34 = arith.addf %7, %33 : vector<16x32xf32>
    %35 = vector.extract_strided_slice %3 {offsets = [0, 16], sizes = [16, 16], strides = [1, 1]} : vector<16x96xf32> to vector<16x16xf32>
    %36 = arith.truncf %35 : vector<16x16xf32> to vector<16x16xbf16>
    %37 = vector.shape_cast %36 : vector<16x16xbf16> to vector<2x8x16xbf16>
    %38 = vector.extract_strided_slice %3 {offsets = [0, 48], sizes = [16, 16], strides = [1, 1]} : vector<16x96xf32> to vector<16x16xf32>
    %39 = arith.truncf %38 : vector<16x16xf32> to vector<16x16xbf16>
    %40 = vector.shape_cast %39 : vector<16x16xbf16> to vector<2x8x16xbf16>
    %41 = vector.extract_strided_slice %3 {offsets = [0, 80], sizes = [16, 16], strides = [1, 1]} : vector<16x96xf32> to vector<16x16xf32>
    %42 = arith.truncf %41 : vector<16x16xf32> to vector<16x16xbf16>
    %43 = vector.shape_cast %42 : vector<16x16xbf16> to vector<2x8x16xbf16>
    %cst_13 = arith.constant dense<0.000000e+00> : vector<2x8x8xf32>
    %44 = tpu.matmul %37, %40, %cst_13 {dimension_numbers = #tpu.dot_dimension_numbers<[2], [2], [1], [1], [0, 0, 0, 1, 1, 1], [0], [0]>} : vector<2x8x16xbf16>, vector<2x8x16xbf16>, vector<2x8x8xf32> -> vector<2x8x8xf32>
    %cst_14 = arith.constant dense<0xFF800000> : vector<2x8xf32>
    %45 = vector.multi_reduction <maximumf>, %44, %cst_14 [2] : vector<2x8x8xf32> to vector<2x8xf32>
    %46 = vector.shape_cast %45 : vector<2x8xf32> to vector<2x8x1xf32>
    %47 = vector.broadcast %46 : vector<2x8x1xf32> to vector<2x8x8xf32>
    %48 = arith.subf %44, %47 : vector<2x8x8xf32>
    %49 = math.exp %48 : vector<2x8x8xf32>
    %cst_15 = arith.constant dense<0.000000e+00> : vector<2x8xf32>
    %50 = vector.multi_reduction <add>, %49, %cst_15 [2] : vector<2x8x8xf32> to vector<2x8xf32>
    %51 = vector.shape_cast %50 : vector<2x8xf32> to vector<2x8x1xf32>
    %52 = tpu.reciprocal %51 {approx = true} : vector<2x8x1xf32> -> vector<2x8x1xf32>
    %53 = vector.broadcast %52 : vector<2x8x1xf32> to vector<2x8x8xf32>
    %54 = arith.mulf %49, %53 : vector<2x8x8xf32>
    %55 = arith.truncf %54 : vector<2x8x8xf32> to vector<2x8x8xbf16>
    %cst_16 = arith.constant dense<0.000000e+00> : vector<2x8x16xf32>
    %56 = tpu.matmul %55, %43, %cst_16 {dimension_numbers = #tpu.dot_dimension_numbers<[2], [1], [1], [2], [0, 0, 0, 1, 1, 2], [0], [0]>} : vector<2x8x8xbf16>, vector<2x8x16xbf16>, vector<2x8x16xf32> -> vector<2x8x16xf32>
    %57 = vector.shape_cast %56 : vector<2x8x16xf32> to vector<16x16xf32>
    %58 = arith.truncf %57 : vector<16x16xf32> to vector<16x16xbf16>
    %59 = vector.extract_strided_slice %4 {offsets = [16, 0], sizes = [16, 32], strides = [1, 1]} : vector<32x32xbf16> to vector<16x32xbf16>
    %cst_17 = arith.constant dense<0.000000e+00> : vector<16x32xf32>
    %60 = tpu.matmul %58, %59, %cst_17 {dimension_numbers = #tpu.dot_dimension_numbers<[1], [0], [0], [1], [0, 0, 1, 1], [], []>} : vector<16x16xbf16>, vector<16x32xbf16>, vector<16x32xf32> -> vector<16x32xf32>
    %61 = arith.addf %34, %60 : vector<16x32xf32>
    %62 = vector.shape_cast %61 : vector<16x32xf32> to vector<2x8x32xf32>
    %c0_18 = arith.constant 0 : index
    %c0_19 = arith.constant 0 : index
    %c0_20 = arith.constant 0 : index
    %63 = vector.load %arg5[%c0_18, %c0_19, %c0_20] : memref<2x8x32xf32, #tpu.memory_space<vmem>>, vector<2x8x32xf32>
    tpu.vector_store %arg5[%c0_18, %c0_19, %c0_20], %62 {strides = array<i32>} : memref<2x8x32xf32, #tpu.memory_space<vmem>>, vector<2x8x32xf32>,
    return
  }
  func.func @transform_0(%arg0: i32) -> (i32, i32, i32) {
    %c0_i32 = arith.constant 0 : i32
    %c0_i32_0 = arith.constant 0 : i32
    %c0_i32_1 = arith.constant 0 : i32
    return %arg0, %c0_i32, %c0_i32_0 : i32, i32, i32
  }
  func.func @transform_1(%arg0: i32) -> (i32, i32) {
    %c0_i32 = arith.constant 0 : i32
    %c0_i32_0 = arith.constant 0 : i32
    %c0_i32_1 = arith.constant 0 : i32
    return %c0_i32, %c0_i32_0 : i32, i32
  }
  func.func @transform_2(%arg0: i32) -> (i32, i32) {
    %c0_i32 = arith.constant 0 : i32
    %c0_i32_0 = arith.constant 0 : i32
    %c0_i32_1 = arith.constant 0 : i32
    return %c0_i32, %c0_i32_0 : i32, i32
  }
  func.func @transform_3(%arg0: i32) -> (i32, i32) {
    %c0_i32 = arith.constant 0 : i32
    %c0_i32_0 = arith.constant 0 : i32
    %c0_i32_1 = arith.constant 0 : i32
    return %c0_i32, %c0_i32_0 : i32, i32
  }
  func.func @transform_4(%arg0: i32) -> (i32, i32, i32) {
    %c0_i32 = arith.constant 0 : i32
    %c0_i32_0 = arith.constant 0 : i32
    %c0_i32_1 = arith.constant 0 : i32
    return %arg0, %c0_i32, %c0_i32_0 : i32, i32, i32
  }
}

</mosaic_0001>

<bundles_post_ra>
// kernel: tpu_custom_call.1
= control target key start
LH: loop header
LB: loop body
LE: loop exit
PB: predicated region body
PF: predicated region fallthrough
CT: control target
= control target key end

     0   :  { %9 = vsyncpa [#allocation3], 0  ;;  %s1747_s0 = inlined_call_operand.hbm [shape: bf16[4,8,32], index: 0, kind: input, shape index: {}]   ;;  %s1748_s1 = inlined_call_operand.hbm [shape: bf16[32,96], index: 1, kind: input, shape index: {}]   ;;  %s1749_s2 = inlined_call_operand.hbm [shape: bf16[32,32], index: 2, kind: input, shape index: {}]   ;;  %s1750_s3 = inlined_call_operand.vmem [shape: f32[1,32], index: 3, kind: input, shape index: {}]   ;;  %s1751_s4 = inlined_call_operand.hbm [shape: f32[4,8,32], index: 4, kind: output, shape index: {}]  }
   0x1   :  { %11 = vsyncpa [#allocation3 + $0x1], 0 }
   0x2   :  { %12 = vsyncpa [#allocation6], 0 }
   0x3   :  { %13 = vsyncpa [#allocation4], 0 }
   0x4   :  { %15 = vsyncpa [#allocation4 + $0x1], 0  ;;  %s1421_s15 = smov 0   ;;  %s1423_s16 = smov 0  }
   0x5   :  { %s1425_s17 = smov 0   ;;  %s1427_s18 = smov 0  }
   0x6 LB: > { %s1442_s19 = sadd.s32 4294967295, %s1379_s18   ;;  %s986_s20 = sadd.s32 4294967294, %s1379_s18   ;;  %s1379_s18 = sphi %s1427_s18, %s1771_s18   ;;  %s1375_s17 = sphi %s1425_s17, %s1770_s17   ;;  %s1371_s16 = sphi %s1423_s16, %s1769_s16   ;;  %s1367_s15 = sphi %s1421_s15, %s1768_s15  }
   0x7   : > { %p41_p0 = scmp.ne.s32.totalorder %s1371_s16, %s1367_s15  ;;  %p1752_p1 = scmp.eq.s32.totalorder %s1442_s19, 0 }
   0x8   : > { %p134_p3 = scmp.eq.s32.totalorder %s986_s20, 1  ;;  %p987_p5 = scmp.ge.s32.totalorder %s1379_s18, 1 }
   0x9   : > { %p1451_p4 = por %p1752_p1, %p41_p0  ;;  %p141_p7 = scmp.lt.s32.totalorder %s1379_s18, 3 }
   0xa   : > { %p1456_p6 = por %p134_p3, %p41_p0  ;;  %s1381_s24 = smov [#allocation5]  }
   0xb   : > { %s1755_s21 = scalar_select %p1451_p4, 1, 0 }
   0xc   : > { %s1756_s22 = scalar_select %p1456_p6, 1, 0 }
   0xd   : > { %p1461_p8 = pnand %p987_p5, %p141_p7  ;;  %s153_s25 = sshll.u32 %s1381_s24, 4  ;;  %s1465_s25 = int_to_ptr.vmem [resolvable:$true] %s153_s25 }
   0xe   : > { %s1382_s27 = smov [#allocation7]   ;;  %s1223_s5 = scalar_lea.hbm %s1748_s1, 256 }
   0xf   : > { %p1136_p9 = pneg %p1461_p8  ;;  %s166_s28 = sshll.u32 %s1382_s27, 4  ;;  %s1476_s28 = int_to_ptr.vmem [resolvable:$true] %s166_s28 }
  0x10   : > { %p1224_p12 = scmp.ne.s32.totalorder %s1748_s1, %s1223_s5  ;;  %p1230_p5 = scmp.lt.u32.totalorder %s1223_s5, %s1748_s1 }
  0x11   : > { %p1472_p11 = pnand %p1136_p9, %p1752_p1 }
  0x13   : > { %p1225_p13 = pneg %p1472_p11 }
  0x15   : > { %p1226_p0 = pnand %p1225_p13, %p1224_p12 }
  0x17   : > { %p1227_p3 = pneg %p1226_p0 }
  0x19   : > { %p1232_p7 = pnand %p1230_p5, %p1227_p3 }
  0x1b   : > { %1235 = shalt.err (!%p1232_p7)
}
  0x1c   : > { %s1236_s10 = scalar_lea.vmem %s1465_s25, 256  ;;  %p1244_p2 = scmp.lt.s32.totalorder %s1465_s25, %s1465_s25 }
  0x1d   : > { %p1237_p9 = scmp.ne.s32.totalorder %s1465_s25, %s1236_s10  ;;  %p1245_p12 = scmp.lt.s32.totalorder %s1236_s10, %s1236_s10 }
  0x1f   : > { %p1239_p10 = pnand %p1237_p9, %p1225_p13  ;;  %p1246_p0 = por %p1245_p12, %p1244_p2 }
  0x21   : > { %p1240_p1 = pneg %p1239_p10 }
  0x23   : > { %p1247_p6 = pnand %p1246_p0, %p1240_p1 }
  0x25   : > { %1250 = shalt.err (!%p1247_p6)
}
  0x26   : > { %s1383_s11 = smov 64   ;;  %s1384_s12 = smov 4  }
  0x27   : > { %1139 = dma.hbm_to_vmem [thread:$0]  (!%p1472_p11), %s1748_s1, 256, %s1465_s25, [#allocation6], %s1383_s11, %s1383_s11, %s1384_s12  }
  0x28   : > { %s1251_s27 = scalar_lea.hbm %s1749_s2, 256 }
  0x29   : > { %p1252_p1 = scmp.ne.s32.totalorder %s1749_s2, %s1251_s27  ;;  %p1258_p10 = scmp.lt.u32.totalorder %s1251_s27, %s1749_s2 }
  0x2b   : > { %p1254_p2 = pnand %p1252_p1, %p1225_p13 }
  0x2d   : > { %p1255_p6 = pneg %p1254_p2 }
  0x2f   : > { %p1260_p3 = pnand %p1258_p10, %p1255_p6 }
  0x31   : > { %1263 = shalt.err (!%p1260_p3)
}
  0x32   : > { %s1264_s25 = scalar_lea.vmem %s1476_s28, 256  ;;  %p1272_p12 = scmp.lt.s32.totalorder %s1476_s28, %s1476_s28 }
  0x33   : > { %p1265_p5 = scmp.ne.s32.totalorder %s1476_s28, %s1264_s25  ;;  %p1273_p0 = scmp.lt.s32.totalorder %s1264_s25, %s1264_s25 }
  0x35   : > { %p1267_p7 = pnand %p1265_p5, %p1225_p13  ;;  %p1274_p1 = por %p1273_p0, %p1272_p12 }
  0x37   : > { %p1268_p9 = pneg %p1267_p7 }
  0x39   : > { %p1275_p2 = pnand %p1274_p1, %p1268_p9 }
  0x3b   : > { %1278 = shalt.err (!%p1275_p2)
}
  0x3c   : > { %1142 = dma.hbm_to_vmem [thread:$0]  (!%p1472_p11), %s1749_s2, 256, %s1476_s28, [#allocation6], %s1383_s11, %s1383_s11, %s1384_s12  }
  0x3d   : > { %s1537_s26 = sadd.s32 1, %s1379_s18   ;;  %s28_s9 = sadd.s32 1, %s1375_s17 }
  0x3e   : > { %s25_s10 = ssub.s32 %s1379_s18, %s1537_s26  ;;  %p35_p13 = scmp.ne.s32.totalorder %s1375_s17, %s1371_s16 }
  0x3f   : > { %p26_p6 = scmp.eq.s32.totalorder %s25_s10, 0  ;;  %p36_p10 = scmp.eq.s32.totalorder %s1379_s18, 0 }
  0x40   : > { %p1759_p3 = scmp.eq.s32.totalorder %s1442_s19, 1  ;;  %p1153_p7 = scmp.lt.s32.totalorder %s1379_s18, 2 }
  0x41   : > { %s1553_s14 = scalar_select %p26_p6, %s1375_s17, %s28_s9  }
  0x42   : > { %p1547_p5 = por %p1759_p3, %p35_p13  ;;  %p37_p9 = por %p36_p10, %p35_p13 }
  0x43   : > { %s183_s20 = sand.u32 1, %s1375_s17   ;;  %s1023_s28 = sshll.u32 %s1379_s18, 7 }
  0x44   : > { %s1760_s13 = scalar_select %p1547_p5, 1, 0 }
  0x45   : > { %s991_s24 = sshll.u32 %s183_s20, 3  ;;  %s1560_s30 = scalar_lea.hbm %s1747_s0, %s1023_s28 }
  0x46   : > { %s187_s5 = scalar_lea.vmem [#allocation2], %s991_s24  ;;  %p1564_p11 = pnand %p1153_p7, %p37_p9 }
  0x47   : > { %s194_s6 = sshll.u32 %s187_s5, 4  ;;  %s1568_s7 = scalar_lea.sflag [#allocation3], %s183_s20  ;;  %s1562_s6 = int_to_ptr.vmem [resolvable:$true] %s194_s6 }
  0x48   : > { %s1279_s8 = scalar_lea.hbm %s1560_s30, 128  ;;  %p1281_p0 = pneg %p1564_p11 }
  0x49   : > { %p1280_p12 = scmp.ne.s32.totalorder %s1560_s30, %s1279_s8  ;;  %s1284_s24 = scalar_lea.hbm %s1747_s0, 256 }
  0x4a   : > { %p1285_p13 = scmp.lt.u32.totalorder %s1560_s30, %s1747_s0  ;;  %p1286_p6 = scmp.lt.u32.totalorder %s1284_s24, %s1279_s8 }
  0x4b   : > { %p1282_p1 = pnand %p1281_p0, %p1280_p12  ;;  %p1288_p3 = scmp.lt.u32.totalorder %s1279_s8, %s1560_s30 }
  0x4c   : > { %p1287_p10 = por %p1286_p6, %p1285_p13 }
  0x4d   : > { %p1283_p2 = pneg %p1282_p1 }
  0x4e   : > { %p1289_p7 = por %p1288_p3, %p1287_p10 }
  0x50   : > { %p1290_p9 = pnand %p1289_p7, %p1283_p2 }
  0x52   : > { %1293 = shalt.err (!%p1290_p9)
}
  0x53   : > { %s1294_s20 = scalar_lea.vmem %s1562_s6, 128  ;;  %s1385_s29 = smov [#allocation2]  }
  0x54   : > { %p1295_p12 = scmp.ne.s32.totalorder %s1562_s6, %s1294_s20  ;;  %s1299_s5 = sshll.u32 %s1385_s29, 4  ;;  %s1300_s5 = int_to_ptr.vmem [resolvable:$false] %s1299_s5 }
  0x55   : > { %s1301_s9 = scalar_lea.vmem %s1300_s5, 256  ;;  %p1302_p4 = scmp.lt.s32.totalorder %s1562_s6, %s1300_s5 }
  0x56   : > { %p1297_p1 = pnand %p1295_p12, %p1281_p0  ;;  %p1303_p13 = scmp.lt.s32.totalorder %s1301_s9, %s1294_s20 }
  0x58   : > { %p1298_p5 = pneg %p1297_p1  ;;  %p1304_p6 = por %p1303_p13, %p1302_p4 }
  0x5a   : > { %p1305_p10 = pnand %p1304_p6, %p1298_p5 }
  0x5c   : > { %1308 = shalt.err (!%p1305_p10)
}
  0x5d   : > { %1146 = dma.hbm_to_vmem [thread:$0]  (!%p1564_p11), %s1560_s30, 128, %s1562_s6, %s1568_s7, %s1383_s11, %s1383_s11, %s1384_s12  }
  0x5e   : > { %206 = sbr.rel (%p1461_p8) target bundleno = 2179 (0x883), region = 36  ;;  %s1602_s8 = sand.u32 (!%p1461_p8), 1, %s1371_s16  }
  0x5f   : > { %s995_s10 = sshll.u32 (!%p1461_p8), %s1602_s8, 3  ;;  %s209_s24 = scalar_lea.sflag (!%p1461_p8), [#allocation3], %s1602_s8 }
  0x60   : > { %s212_s28 = scalar_lea.vmem (!%p1461_p8), [#allocation2], %s995_s10  ;;  %p1762_p4 = scmp.ne.s32.totalorder (!%p1461_p8), %s1755_s21, 0 }
  0x65   : > { %1354 = dma.done.wait (%p1762_p4), %s209_s24, 128  }
  0x66   : > { %1356 = vsyncadd (%p1762_p4), %s209_s24, 4294967168  ;;  %p1763_p5 = scmp.eq.s32.totalorder %s1442_s19, 0 }
  0x68   : > { %1358 = dma.done.wait (%p1763_p5), [#allocation6], 512   ;;  %p1764_p11 = pmov %p1763_p5 }
  0x69   : > { %v1386_v0 = vmov 0.0   ;;  %vm1387_vm0 = vmmov 0   ;;  %v1202_v1 = vld [vmem:[#allocation5] sm:$0xff]   ;;  %v1203_v2 = vld [vmem:[#allocation5 + $0x8] sm:$0xff]   ;;  %v1204_v3 = vld [vmem:[%s212_s28] sm:$0xff]   ;;  %vm271_vm1 = vcmask 261120  }
  0x6a   : > { %1360 = vsyncadd (%p1764_p11), [#allocation6], 4294966784  ;;  %1050 = vmatprep.subr.bf16.mxu0 %v1386_v0  ;;  %1054 = vmatprep.mubr.msk.bf16.mxu0 %vm1387_vm0, %v1386_v0  ;;  %s1388_s21 = smov 96   ;;  %vm335_vm2 = vcmask 130048   ;;  %vm430_vm3 = vcmask 64512   ;;  %s1389_s23 = smov 64  }
  0x6b   : > { %1058 = vmatprep.subr.bf16.mxu1 %v1386_v0  ;;  %1060 = vmatprep.mubr.msk.bf16.mxu1 %vm1387_vm0, %v1386_v0  ;;  %vm460_vm4 = vcmask 1043456   ;;  %s1390_s11 = smov 112   ;;  %s1391_s12 = smov 80   ;;  %v1205_v42 = vld [vmem:[#allocation7] sm:$0xff]  }
  0x6c   : > { %1051 = vmatpush3.bf16.msra.mxu0 %v1202_v1  ;;  %s1392_s30 = smov 48   ;;  %s998_s6 = sshll.u32 %s1602_s8, 4 }
  0x6d   : > { %1052 = vmatprep.subr.bf16.mxu0 %v1386_v0  ;;  %s244_s27 = scalar_lea.vmem [#allocation8], %s998_s6  ;;  %s1026_s29 = sshll.u32 %s1442_s19, 8 }
  0x6e   : > { %s894_s20 = sshll.u32 %s244_s27, 4  ;;  %s1701_s10 = scalar_lea.hbm %s1751_s4, %s1026_s29  ;;  %s1696_s20 = int_to_ptr.vmem [resolvable:$true] %s894_s20 }
  0x6f   : > { %s881_s19 = scalar_lea.sflag [#allocation4], %s1602_s8  ;;  %s1309_s24 = scalar_lea.vmem %s1696_s20, 256 }
  0x70   : > { %1053 = vmatpush3.bf16.msra.mxu0 %v1203_v2  ;;  %p1310_p8 = scmp.ne.s32.totalorder %s1696_s20, %s1309_s24  ;;  %p1765_p0 = scmp.ne.s32.totalorder %s1760_s13, 0 }
  0x71   : > { %1064 = vmatprep.subr.bf16.mxu0 %v1386_v0  ;;  %s1393_s28 = smov [#allocation8]  }
  0x72   : > { %p1311_p2 = pnand %p1310_p8, %p1765_p0 }
  0x73   : > { %1055 = vmatmul.mubr.msk.bf16.vlgmr.msra.gmra.mrb[0].mxu0 %vm271_vm1, %v1204_v3 }
  0x74   : > { %1066 = vmatprep.mubr.msk.bf16.mxu0 %vm1387_vm0, %v1386_v0  ;;  %p1312_p3 = pneg %p1311_p2 }
 0x146   : > { %v309_v4 = vpop.f32.mrb[0].mxu0 }
 0x147   : > { %v1625_v5 = vpack.c.bf16 %v309_v4, %v309_v4  ;;  %v1056_v6 = vpop.f32.mrb[1].mxu0 }
 0x148   : > { %v312_v7 = vpop.f32.mrb[2].mxu0 }
 0x149   : > { %333 = vrot.lane.b32.xlu0 %v1625_v5, %s1388_s21  ;;  %v1057_v8 = vpop.f32.mrb[3].mxu0  ;;  %v1628_v9 = vpack.c.bf16 %v312_v7, %v312_v7 }
 0x14d   : > { %382 = vrot.lane.b32.xlu0 %v1628_v9, %s1388_s21  ;;  %s1313_s21 = sshll.u32 %s1393_s28, 4  ;;  %s1314_s21 = int_to_ptr.vmem [resolvable:$false] %s1313_s21 }
 0x14e   : > { %p1316_p7 = scmp.lt.s32.totalorder %s1696_s20, %s1314_s21 }
 0x1bb   : > { %v334_v10 = vpop.permute.xlu0 %333 }
 0x1bc   : > { %v340_v11 = vsel %vm335_vm2, %v334_v10, 0 }
 0x1bd   : > { %1059 = vmatpush3.bf16.xpose.msra.mxu1 %v340_v11 }
 0x1be   : > { %1070 = vmatprep.subr.bf16.mxu1 %v1386_v0 }
 0x1bf   : > { %v383_v12 = vpop.permute.xlu0 %382 }
 0x1c0   : > { %v388_v13 = vsel %vm335_vm2, %v383_v12, 0 }
 0x1c1   : > { %1065 = vmatpush3.bf16.xpose.msra.mxu0 %v388_v13 }
 0x1c2   : > { %1076 = vmatprep.subr.bf16.mxu0 %v1386_v0 }
 0x1c4   : > { %1061 = vmatmul.mubr.msk.bf16.vlgmr.msra.gmra.mrb[0].mxu1 %vm335_vm2, %v1625_v5 }
 0x1c5   : > { %1072 = vmatprep.mubr.msk.bf16.mxu1 %vm1387_vm0, %v1386_v0 }
 0x1c8   : > { %1067 = vmatmul.mubr.msk.bf16.vlgmr.msra.gmra.mrb[4].mxu0 %vm335_vm2, %v1628_v9 }
 0x1c9   : > { %1078 = vmatprep.mubr.msk.bf16.mxu0 %vm1387_vm0, %v1386_v0 }
 0x297   : > { %v376_v14 = vpop.f32.mrb[0].mxu1 }
 0x298   : > { %v1062_v15 = vpop.f32.mrb[1].mxu1  ;;  %v431_v16 = vsel %vm430_vm3, %v376_v14, -inf }
 0x299   : > { %432 = vmax.xlane.f32.xlu1 %v431_v16  ;;  %v379_v17 = vpop.f32.mrb[2].mxu1 }
 0x29a   : > { %v1063_v18 = vpop.f32.mrb[3].mxu1 }
 0x29b   : > { %v424_v19 = vpop.f32.mrb[4].mxu0 }
 0x29c   : > { %v1068_v20 = vpop.f32.mrb[5].mxu0  ;;  %v434_v21 = vsel %vm430_vm3, %v424_v19, -inf }
 0x29d   : > { %435 = vmax.xlane.f32.xlu1 %v434_v21  ;;  %v427_v22 = vpop.f32.mrb[6].mxu0 }
 0x29e   : > { %v1069_v23 = vpop.f32.mrb[7].mxu0 }
 0x2ae   : > { %455 = vrot.lane.b32.xlu1 %v1625_v5, %s1389_s23 }
 0x326   : > { %v433_v24 = vpop.xlane.xlu1 %432 }
 0x327   : > { %v437_v25 = vsub.f32 %v376_v14, %v433_v24 }
 0x329   : > { %v439_v26 = vmul.f32 1.442695, %v437_v25 }
 0x32a   : > { %v436_v27 = vpop.xlane.xlu1 %435 }
 0x32b   : > { %1207 = vpow2.f32 %v439_v26  ;;  %v438_v28 = vsub.f32 %v424_v19, %v436_v27 }
 0x32d   : > { %v441_v29 = vmul.f32 1.442695, %v438_v28 }
 0x32e   : > { %v456_v30 = vpop.permute.xlu1 %455 }
 0x32f   : > { %1209 = vpow2.f32 %v441_v29  ;;  %v462_v31 = vsel %vm460_vm4, %v456_v30, 0 }
 0x330   : > { %1071 = vmatpush3.bf16.msra.mxu1 %v462_v31 }
 0x331   : > { %1082 = vmatprep.subr.bf16.mxu1 %v1386_v0 }
 0x335   : > { %v1208_v32 = vpop.eup %1207 }
 0x336   : > { %v443_v33 = vsel %vm430_vm3, %v1208_v32, 0.0 }
 0x337   : > { %444 = vadd.xlane.f32.xlu0 %v443_v33 }
 0x339   : > { %v1210_v34 = vpop.eup %1209 }
 0x33a   : > { %v446_v35 = vsel %vm430_vm3, %v1210_v34, 0.0 }
 0x33b   : > { %447 = vadd.xlane.f32.xlu1 %v446_v35 }
 0x34c   : > { %504 = vrot.lane.b32.xlu1 %v1628_v9, %s1389_s23  ;;  %s1315_s23 = scalar_lea.vmem %s1314_s21, 512 }
 0x34d   : > { %605 = vrot.lane.b32.xlu0 %v1625_v5, %s1390_s11  ;;  %p1317_p9 = scmp.lt.s32.totalorder %s1315_s23, %s1309_s24 }
 0x34f   : > { %p1318_p12 = por %p1317_p9, %p1316_p7 }
 0x350   : > { %607 = vrot.lane.b32.xlu1 %v1625_v5, %s1391_s12 }
 0x351   : > { %p1319_p1 = pnand %p1318_p12, %p1312_p3 }
 0x354   : > { %657 = vrot.lane.b32.xlu1 %v1628_v9, %s1391_s12 }
 0x358   : > { %655 = vrot.lane.b32.xlu1 %v1628_v9, %s1390_s11 }
 0x3c4   : > { %v445_v36 = vpop.xlane.xlu0 %444 }
 0x3c5   : > { %1211 = vrcp.f32 %v445_v36 }
 0x3c8   : > { %v448_v37 = vpop.xlane.xlu1 %447  ;;  %v606_v49 = vpop.permute.xlu0 %605 }
 0x3c9   : > { %1213 = vrcp.f32 %v448_v37 }
 0x3cc   : > { %v505_v38 = vpop.permute.xlu1 %504 }
 0x3cd   : > { %v510_v39 = vsel %vm460_vm4, %v505_v38, 0 }
 0x3ce   : > { %1077 = vmatpush3.bf16.msra.mxu0 %v510_v39 }
 0x3cf   : > { %v1212_v40 = vpop.eup %1211  ;;  %1088 = vmatprep.subr.bf16.mxu0 %v1386_v0 }
 0x3d0   : > { %v451_v41 = vmul.f32 %v1212_v40, %v1208_v32  ;;  %v608_v46 = vpop.permute.xlu1 %607 }
 0x3d1   : > { %v613_v48 = vsel %vm335_vm2, %v608_v46, 0 }
 0x3d2   : > { %v453_v43 = vpack.c.bf16 %v451_v41, %v451_v41 }
 0x3d3   : > { %v1214_v44 = vpop.eup %1213 }
 0x3d4   : > { %v452_v45 = vmul.f32 %v1214_v44, %v1210_v34  ;;  %1073 = vmatmul.mubr.msk.bf16.vlgmr.msra.gmra.mrb[4].mxu1 %vm430_vm3, %v453_v43  ;;  %v658_v54 = vpop.permute.xlu1 %657 }
 0x3d5   : > { %1083 = vmatpush3.bf16.msra.mxu1 %v1205_v42  ;;  %1084 = vmatprep.mubr.msk.bf16.mxu1 %vm1387_vm0, %v1386_v0  ;;  %v663_v59 = vsel %vm335_vm2, %v658_v54, 0 }
 0x3d6   : > { %v454_v47 = vpack.c.bf16 %v452_v45, %v452_v45  ;;  %1094 = vmatprep.subr.bf16.mxu1 %v1386_v0 }
 0x3d8   : > { %1079 = vmatmul.mubr.msk.bf16.vlgmr.msra.gmra.mrb[8].mxu0 %vm430_vm3, %v454_v47  ;;  %v656_v1 = vpop.permute.xlu1 %655 }
 0x3d9   : > { %1089 = vmatpush3.bf16.xpose.msra.mxu0 %v613_v48  ;;  %1090 = vmatprep.mubr.msk.bf16.mxu0 %vm1387_vm0, %v1386_v0 }
 0x3da   : > { %1100 = vmatprep.subr.bf16.mxu0 %v1386_v0 }
 0x3e0   : > { %1091 = vmatmul.mubr.msk.bf16.vlgmr.msra.gmra.mrb[12].mxu0 %vm335_vm2, %v606_v49 }
 0x3e1   : > { %1102 = vmatprep.mubr.msk.bf16.mxu0 %vm1387_vm0, %v1386_v0 }
 0x4a7   : > { %v498_v50 = vpop.f32.mrb[4].mxu1 }
 0x4a8   : > { %v1074_v51 = vpop.f32.mrb[5].mxu1 }
 0x4a9   : > { %v501_v52 = vpop.f32.mrb[6].mxu1 }
 0x4aa   : > { %v1075_v53 = vpop.f32.mrb[7].mxu1 }
 0x4ab   : > { %v546_v55 = vpop.f32.mrb[8].mxu0 }
 0x4ac   : > { %v552_v56 = vpack.c.bf16 %v546_v55, %v498_v50  ;;  %v1080_v57 = vpop.f32.mrb[9].mxu0 }
 0x4ad   : > { %v549_v58 = vpop.f32.mrb[10].mxu0 }
 0x4ae   : > { %v1081_v60 = vpop.f32.mrb[11].mxu0  ;;  %1085 = vmatmul.mubr.msk.bf16.vlgmr.msra.gmra.mrb[8].mxu1 %vm335_vm2, %v552_v56 }
 0x4af   : > { %1095 = vmatpush3.bf16.xpose.msra.mxu1 %v663_v59  ;;  %1096 = vmatprep.mubr.msk.bf16.mxu1 %vm1387_vm0, %v1386_v0 }
 0x4b0   : > { %1106 = vmatprep.subr.bf16.mxu1 %v1386_v0 }
 0x4b3   : > { %v649_v61 = vpop.f32.mrb[12].mxu0 }
 0x4b4   : > { %v1092_v62 = vpop.f32.mrb[13].mxu0  ;;  %v705_v63 = vsel %vm430_vm3, %v649_v61, -inf }
 0x4b5   : > { %706 = vmax.xlane.f32.xlu1 %v705_v63  ;;  %v652_v2 = vpop.f32.mrb[14].mxu0 }
 0x4b6   : > { %v1093_v3 = vpop.f32.mrb[15].mxu0  ;;  %1097 = vmatmul.mubr.msk.bf16.vlgmr.msra.gmra.mrb[12].mxu1 %vm335_vm2, %v656_v1 }
 0x4b7   : > { %1108 = vmatprep.mubr.msk.bf16.mxu1 %vm1387_vm0, %v1386_v0 }
 0x542   : > { %v707_v4 = vpop.xlane.xlu1 %706 }
 0x543   : > { %v711_v6 = vsub.f32 %v649_v61, %v707_v4 }
 0x545   : > { %v713_v7 = vmul.f32 1.442695, %v711_v6 }
 0x547   : > { %1215 = vpow2.f32 %v713_v7 }
 0x551   : > { %v1216_v8 = vpop.eup %1215 }
 0x552   : > { %v717_v10 = vsel %vm430_vm3, %v1216_v8, 0.0 }
 0x553   : > { %718 = vadd.xlane.f32.xlu1 %v717_v10 }
 0x589   : > { %v699_v11 = vpop.f32.mrb[12].mxu1 }
 0x58a   : > { %v1098_v12 = vpop.f32.mrb[13].mxu1  ;;  %v708_v13 = vsel %vm430_vm3, %v699_v11, -inf }
 0x58b   : > { %709 = vmax.xlane.f32.xlu0 %v708_v13  ;;  %v702_v14 = vpop.f32.mrb[14].mxu1 }
 0x58c   : > { %v1099_v15 = vpop.f32.mrb[15].mxu1 }
 0x5a1   : > { %777 = vrot.lane.b32.xlu0 %v1628_v9, %s1392_s30 }
 0x5e0   : > { %v719_v23 = vpop.xlane.xlu1 %718 }
 0x618   : > { %v710_v16 = vpop.xlane.xlu0 %709 }
 0x619   : > { %v712_v17 = vsub.f32 %v699_v11, %v710_v16 }
 0x61b   : > { %v715_v18 = vmul.f32 1.442695, %v712_v17 }
 0x61c   : > { %v778_v19 = vpop.permute.xlu0 %777 }
 0x61d   : > { %1217 = vpow2.f32 %v715_v18  ;;  %v783_v20 = vsel %vm460_vm4, %v778_v19, 0 }
 0x61e   : > { %1107 = vmatpush3.bf16.msra.mxu1 %v783_v20  ;;  %1219 = vrcp.f32 %v719_v23 }
 0x61f   : > { %1112 = vmatprep.subr.bf16.mxu1 %v1386_v0 }
 0x627   : > { %v1218_v21 = vpop.eup %1217 }
 0x628   : > { %v720_v22 = vsel %vm430_vm3, %v1218_v21, 0.0  ;;  %v1220_v24 = vpop.eup %1219 }
 0x629   : > { %721 = vadd.xlane.f32.xlu1 %v720_v22  ;;  %v725_v25 = vmul.f32 %v1220_v24, %v1216_v8 }
 0x62b   : > { %v727_v28 = vpack.c.bf16 %v725_v25, %v725_v25 }
 0x63a   : > { %729 = vrot.lane.b32.xlu1 %v1625_v5, %s1392_s30  ;;  %v1206_v5 = vld [vmem:[#allocation7 + $0x8] sm:$0xff]  }
 0x6b6   : > { %v722_v9 = vpop.xlane.xlu1 %721 }
 0x6b7   : > { %1221 = vrcp.f32 %v722_v9 }
 0x6ba   : > { %v730_v26 = vpop.permute.xlu1 %729 }
 0x6bb   : > { %v735_v27 = vsel %vm460_vm4, %v730_v26, 0 }
 0x6bc   : > { %1101 = vmatpush3.bf16.msra.mxu0 %v735_v27 }
 0x6bf   : > { %1103 = vmatmul.mubr.msk.bf16.vlgmr.msra.gmra.mrb[16].mxu0 %vm430_vm3, %v727_v28 }
 0x6c1   : > { %v1222_v29 = vpop.eup %1221 }
 0x6c2   : > { %v726_v30 = vmul.f32 %v1222_v29, %v1218_v21 }
 0x6c4   : > { %v728_v31 = vpack.c.bf16 %v726_v30, %v726_v30 }
 0x6c6   : > { %1109 = vmatmul.mubr.msk.bf16.vlgmr.msra.gmra.mrb[16].mxu1 %vm430_vm3, %v728_v31 }
 0x6c7   : > { %1114 = vmatprep.mubr.msk.bf16.mxu1 %vm1387_vm0, %v1386_v0  ;;  %1113 = vmatpush3.bf16.msra.mxu1 %v1206_v5  ;;  %v1003_v0 = vld [vmem:[%s1750_s3] ss:$0 sm:$0xff] }
 0x792   : > { %v771_v32 = vpop.f32.mrb[16].mxu0 }
 0x793   : > { %v1104_v33 = vpop.f32.mrb[17].mxu0 }
 0x794   : > { %v774_v34 = vpop.f32.mrb[18].mxu0 }
 0x795   : > { %v1105_v35 = vpop.f32.mrb[19].mxu0 }
 0x799   : > { %v819_v36 = vpop.f32.mrb[16].mxu1 }
 0x79a   : > { %v825_v37 = vpack.c.bf16 %v819_v36, %v771_v32  ;;  %v1110_v38 = vpop.f32.mrb[17].mxu1 }
 0x79b   : > { %v822_v39 = vpop.f32.mrb[18].mxu1 }
 0x79c   : > { %v1111_v40 = vpop.f32.mrb[19].mxu1  ;;  %1115 = vmatmul.mubr.msk.bf16.vlgmr.msra.gmra.mrb[8].mxu1 %vm335_vm2, %v825_v37 }
 0x86f   : > { %v869_v41 = vpop.f32.mrb[8].mxu1 }
 0x870   : > { %v1118_v42 = vadd.f32 %v1003_v0, %v869_v41  ;;  %v1116_v43 = vpop.f32.mrb[9].mxu1 }
 0x871   : > { %v872_v44 = vpop.f32.mrb[10].mxu1 }
 0x872   : > { %878 = vst.msk [vmem:[%s244_s27] sm:$0xff] %vm271_vm1, %v1118_v42  ;;  %v1119_v45 = vadd.f32 %v1003_v0, %v872_v44  ;;  %v1117_v46 = vpop.f32.mrb[11].mxu1 }
 0x874   : > { %879 = vst.msk [vmem:[%s244_s27 + $0x8] sm:$0xff] %vm271_vm1, %v1119_v45 }
 0x875   : > { %1322 = shalt.err (!%p1319_p1)
}
 0x876   : > { %s1323_s11 = scalar_lea.hbm %s1701_s10, 256  ;;  %s1327_s6 = scalar_lea.hbm %s1751_s4, 512 }
 0x877   : > { %p1324_p13 = scmp.ne.s32.totalorder %s1701_s10, %s1323_s11  ;;  %p1328_p4 = scmp.lt.u32.totalorder %s1701_s10, %s1751_s4 }
 0x878   : > { %p1329_p5 = scmp.lt.u32.totalorder %s1327_s6, %s1323_s11  ;;  %p1331_p8 = scmp.lt.u32.totalorder %s1323_s11, %s1701_s10 }
 0x879   : > { %p1325_p6 = pnand %p1324_p13, %p1765_p0 }
 0x87a   : > { %p1330_p11 = por %p1329_p5, %p1328_p4 }
 0x87b   : > { %p1326_p10 = pneg %p1325_p6 }
 0x87c   : > { %p1332_p2 = por %p1331_p8, %p1330_p11 }
 0x87e   : > { %p1333_p3 = pnand %p1332_p2, %p1326_p10 }
 0x880   : > { %1336 = shalt.err (!%p1333_p3)
}
 0x881   : > { %s1394_s27 = smov 128   ;;  %s1395_s29 = smov 8  }
 0x882   : > { %1134 = dma.vmem_to_hbm [thread:$0]  (%p1765_p0), %s1696_s20, 256, %s1701_s10, %s881_s19, %s1394_s27, %s1394_s27, %s1395_s29  }
 0x883 PF: > { %s909_s5 = sand.u32 1, %s1367_s15   ;;  %p1766_p7 = scmp.ne.s32.totalorder %s1756_s22, 0 }
 0x884   : > { %p1767_p9 = scmp.ge.s32.totalorder %s1379_s18, 2  ;;  %s910_s9 = scalar_lea.sflag [#allocation4], %s909_s5 }
 0x886   : > { %p1148_p12 = pnand %p1767_p9, %p1766_p7 }
 0x888   : > { %1362 = dma.done.wait (!%p1148_p12), %s910_s9, 256  }
 0x889   : > { %1364 = vsyncadd (!%p1148_p12), %s910_s9, 4294967040  ;;  %p18_p1 = scmp.ge.s32.totalorder %s1537_s26, 4   ;;  %s1768_s15 = smov %s1371_s16 }
 0x88a   : > { %s1769_s16 = smov %s1375_s17  ;;  %s1770_s17 = smov %s1553_s14 }
 0x88b   : > { %s1771_s18 = smov %s1537_s26  ;;  %20 = sbr.rel (!%p18_p1) target bundleno = 6 (0x6), region = 89 }
 0x892   :  { %915 = vsyncpa [#allocation3], 1 }
 0x893   :  { %917 = vsyncpa [#allocation3 + $0x1], 1 }
 0x894   :  { %918 = vsyncpa [#allocation6], 1 }
 0x895   :  { %919 = vsyncpa [#allocation4], 1 }
 0x896   :  { %921 = vsyncpa [#allocation4 + $0x1], 1 }

</bundles_post_ra>
